<compile_context>
chip_gen: v7x
topology: tpu7x:2x2x1
jax: 0.10.0
libtpu: 0.0.40
codegen_flags: <defaults>
</compile_context>

<pallas_src>
import functools

import jax
import jax.numpy as jnp
from jax.experimental import pallas as pl
from jax.experimental.pallas import tpu as pltpu

OBS_DIM = 25
HIDDEN_DIM = 64


def rnn_critic_kernel(x_ref, w_ih_ref, w_hh_ref, b_ref, w_fc_ref, b_fc_ref,
                      h0_ref, val_ref, hid_ref):
    """Whole forward pass in one kernel invocation (all operands in VMEM).

    x_ref   : (T*B, D)  time-major, batch-flattened input sequence
    w_ih_ref: (D, H)    input->hidden weight (already transposed)
    w_hh_ref: (H, H)    hidden->hidden weight (already transposed)
    b_ref   : (1, H)    combined bias (b_ih + b_hh)
    w_fc_ref: (1, H)    fc weight row
    b_fc_ref: (1, 1)    fc bias
    h0_ref  : (B, H)    initial hidden state
    val_ref : (B, 1)    output value
    hid_ref : (B, H)    final hidden state
    """
    B, H = h0_ref.shape
    TB, D = x_ref.shape
    T = TB // B  # static

    # Hoisted input projection: one big MXU pass + a single bias add replaces
    # T tiny per-step matmuls and T bias broadcasts inside the recurrence.
    u = (jnp.dot(x_ref[...], w_ih_ref[...],
                 preferred_element_type=jnp.float32)
         + b_ref[...])                                  # (T*B, H)

    w_hh = w_hh_ref[...]                                # hoisted weight load
    h = h0_ref[...]

    # Fully-unrolled recurrence: per-step critical path is one (B,H)x(H,H)
    # matmul (MXU) + one tanh (EUP); the LLO scheduler sees all steps.
    for t in range(T):
        u_t = u[t * B:(t + 1) * B, :]                   # static, 8-aligned slice
        h = jnp.tanh(u_t + jnp.dot(h, w_hh,
                                   preferred_element_type=jnp.float32))

    hid_ref[...] = h
    # fc head: (B,H)*(1,H) elementwise (VPU) -> lane reduce (XLU); avoids a
    # 1-lane MXU matmul.
    val_ref[...] = (jnp.sum(h * w_fc_ref[...], axis=-1, keepdims=True)
                    + b_fc_ref[...])


def init_params(key, obs_dim=OBS_DIM, hidden_dim=HIDDEN_DIM):
    """Deterministic init mirroring nn.RNN / nn.Linear default shapes."""
    k = jax.random.split(key, 6)
    s_rnn = 1.0 / jnp.sqrt(hidden_dim)
    s_fc = 1.0 / jnp.sqrt(hidden_dim)
    return {
        "w_ih": jax.random.uniform(k[0], (hidden_dim, obs_dim), jnp.float32,
                                   -s_rnn, s_rnn),
        "w_hh": jax.random.uniform(k[1], (hidden_dim, hidden_dim), jnp.float32,
                                   -s_rnn, s_rnn),
        "b_ih": jax.random.uniform(k[2], (hidden_dim,), jnp.float32,
                                   -s_rnn, s_rnn),
        "b_hh": jax.random.uniform(k[3], (hidden_dim,), jnp.float32,
                                   -s_rnn, s_rnn),
        "w_fc": jax.random.uniform(k[4], (1, hidden_dim), jnp.float32,
                                   -s_fc, s_fc),
        "b_fc": jax.random.uniform(k[5], (1,), jnp.float32, -s_fc, s_fc),
    }


def rnn_critic_forward(x, params, hidden=None):
    """x: (B, T, obs_dim) float32 (batch_first). Returns (value, hidden)."""
    B, T, D = x.shape
    H = params["w_hh"].shape[0]
    B_pad = max(8, ((B + 7) // 8) * 8)   # sublane-align the batch

    if hidden is None:
        h0 = jnp.zeros((B, H), jnp.float32)
    else:
        h0 = jnp.reshape(hidden, (B, H)).astype(jnp.float32)

    x_f32 = x.astype(jnp.float32)
    if B_pad != B:
        x_p = jnp.zeros((B_pad, T, D), jnp.float32).at[:B].set(x_f32)
        h0_p = jnp.zeros((B_pad, H), jnp.float32).at[:B].set(h0)
    else:
        x_p, h0_p = x_f32, h0

    # Time-major, batch-flattened layout: (B,T,D) -> (T,B,D) -> (T*B, D).
    # Tiny at these sizes; a BlockSpec index_map would replace it at scale.
    x_tb = jnp.transpose(x_p, (1, 0, 2)).reshape(T * B_pad, D)

    w_ih_t = params["w_ih"].T                               # (D, H)
    w_hh_t = params["w_hh"].T                               # (H, H)
    b = (params["b_ih"] + params["b_hh"]).reshape(1, H)     # (1, H)
    w_fc = params["w_fc"].reshape(1, H)                     # (1, H)
    b_fc = params["b_fc"].reshape(1, 1)                     # (1, 1)

    value_p, hid_p = pl.pallas_call(
        rnn_critic_kernel,
        out_shape=(jax.ShapeDtypeStruct((B_pad, 1), jnp.float32),
                   jax.ShapeDtypeStruct((B_pad, H), jnp.float32)),
        in_specs=[pl.BlockSpec(memory_space=pltpu.MemorySpace.VMEM)] * 7,
        out_specs=(pl.BlockSpec(memory_space=pltpu.MemorySpace.VMEM),
                   pl.BlockSpec(memory_space=pltpu.MemorySpace.VMEM)),
    )(x_tb, w_ih_t, w_hh_t, b, w_fc, b_fc, h0_p)

    value = value_p[:B]
    hid = hid_p[:B]
    # PyTorch nn.RNN returns hidden as (num_layers=1, B, H)
    return value, hid.reshape(1, B, H)


# Jit the whole wrapper so the pad/transpose/slice layout plumbing fuses into
# one XLA program around the kernel launch (single dispatch).
rnn_critic_forward_jit = jax.jit(rnn_critic_forward)


def rnn_critic_reference(x, params, hidden=None):
    """Pure-JAX reference for correctness checking."""
    B, T, D = x.shape
    H = params["w_hh"].shape[0]
    h = (jnp.zeros((B, H), jnp.float32) if hidden is None
         else hidden.reshape(B, H).astype(jnp.float32))
    b = params["b_ih"] + params["b_hh"]
    for t in range(T):
        h = jnp.tanh(x[:, t, :] @ params["w_ih"].T + h @ params["w_hh"].T + b)
    value = h @ params["w_fc"].T + params["b_fc"]
    return value, h.reshape(1, B, H)


if __name__ == "__main__":
    key = jax.random.PRNGKey(0)
    k_param, k_x, k_h = jax.random.split(key, 3)

    B, T = 2, 8
    params = init_params(k_param)
    x = jax.random.normal(k_x, (B, T, OBS_DIM), jnp.float32)

    # Case 1: no initial hidden state.
    value, hidden = rnn_critic_forward_jit(x, params)
    jax.block_until_ready((value, hidden))
    ref_value, ref_hidden = rnn_critic_reference(x, params)
    assert value.shape == (B, 1)
    assert hidden.shape == (1, B, HIDDEN_DIM)
    assert jnp.allclose(value, ref_value, atol=1e-4, rtol=1e-4)
    assert jnp.allclose(hidden, ref_hidden, atol=1e-4, rtol=1e-4)

    # Case 2: explicit initial hidden state.
    h_in = 0.1 * jax.random.normal(k_h, (1, B, HIDDEN_DIM), jnp.float32)
    value2, hidden2 = rnn_critic_forward_jit(x, params, h_in)
    jax.block_until_ready((value2, hidden2))
    ref_value2, ref_hidden2 = rnn_critic_reference(x, params, h_in)
    assert jnp.allclose(value2, ref_value2, atol=1e-4, rtol=1e-4)
    assert jnp.allclose(hidden2, ref_hidden2, atol=1e-4, rtol=1e-4)

    print("KERNEL_OK")
</pallas_src>

<mosaic_0001>
module attributes {stable_mosaic.version = 11 : i64} {
  func.func @rnn_critic_kernel(%arg0: memref<64x25xf32, #tpu.memory_space<vmem>>, %arg1: memref<25x64xf32, #tpu.memory_space<vmem>>, %arg2: memref<64x64xf32, #tpu.memory_space<vmem>>, %arg3: memref<1x64xf32, #tpu.memory_space<vmem>>, %arg4: memref<1x64xf32, #tpu.memory_space<vmem>>, %arg5: memref<1x1xf32, #tpu.memory_space<vmem>>, %arg6: memref<8x64xf32, #tpu.memory_space<vmem>>, %arg7: memref<8x1xf32, #tpu.memory_space<vmem>>, %arg8: memref<8x64xf32, #tpu.memory_space<vmem>>) attributes {dimension_semantics = [], scalar_prefetch = 0 : i64, scratch_operands = 0 : i64, tpu.core_type = #tpu.core_type<tc>} {
    %c0 = arith.constant 0 : index
    %c0_0 = arith.constant 0 : index
    %0 = vector.load %arg0[%c0, %c0_0] : memref<64x25xf32, #tpu.memory_space<vmem>>, vector<64x25xf32>
    %c0_1 = arith.constant 0 : index
    %c0_2 = arith.constant 0 : index
    %1 = vector.load %arg1[%c0_1, %c0_2] : memref<25x64xf32, #tpu.memory_space<vmem>>, vector<25x64xf32>
    %cst = arith.constant dense<0.000000e+00> : vector<64x64xf32>
    %2 = tpu.matmul %0, %1, %cst {dimension_numbers = #tpu.dot_dimension_numbers<[1], [0], [0], [1], [0, 0, 1, 1], [], []>} : vector<64x25xf32>, vector<25x64xf32>, vector<64x64xf32> -> vector<64x64xf32>
    %c0_3 = arith.constant 0 : index
    %c0_4 = arith.constant 0 : index
    %3 = vector.load %arg3[%c0_3, %c0_4] : memref<1x64xf32, #tpu.memory_space<vmem>>, vector<1x64xf32>
    %4 = vector.broadcast %3 : vector<1x64xf32> to vector<64x64xf32>
    %5 = arith.addf %2, %4 : vector<64x64xf32>
    %c0_5 = arith.constant 0 : index
    %c0_6 = arith.constant 0 : index
    %6 = vector.load %arg2[%c0_5, %c0_6] : memref<64x64xf32, #tpu.memory_space<vmem>>, vector<64x64xf32>
    %c0_7 = arith.constant 0 : index
    %c0_8 = arith.constant 0 : index
    %7 = vector.load %arg6[%c0_7, %c0_8] : memref<8x64xf32, #tpu.memory_space<vmem>>, vector<8x64xf32>
    %8 = vector.extract_strided_slice %5 {offsets = [0, 0], sizes = [8, 64], strides = [1, 1]} : vector<64x64xf32> to vector<8x64xf32>
    %cst_9 = arith.constant dense<0.000000e+00> : vector<8x64xf32>
    %9 = tpu.matmul %7, %6, %cst_9 {dimension_numbers = #tpu.dot_dimension_numbers<[1], [0], [0], [1], [0, 0, 1, 1], [], []>} : vector<8x64xf32>, vector<64x64xf32>, vector<8x64xf32> -> vector<8x64xf32>
    %10 = arith.addf %8, %9 : vector<8x64xf32>
    %11 = math.tanh %10 : vector<8x64xf32>
    %12 = vector.extract_strided_slice %5 {offsets = [8, 0], sizes = [8, 64], strides = [1, 1]} : vector<64x64xf32> to vector<8x64xf32>
    %cst_10 = arith.constant dense<0.000000e+00> : vector<8x64xf32>
    %13 = tpu.matmul %11, %6, %cst_10 {dimension_numbers = #tpu.dot_dimension_numbers<[1], [0], [0], [1], [0, 0, 1, 1], [], []>} : vector<8x64xf32>, vector<64x64xf32>, vector<8x64xf32> -> vector<8x64xf32>
    %14 = arith.addf %12, %13 : vector<8x64xf32>
    %15 = math.tanh %14 : vector<8x64xf32>
    %16 = vector.extract_strided_slice %5 {offsets = [16, 0], sizes = [8, 64], strides = [1, 1]} : vector<64x64xf32> to vector<8x64xf32>
    %cst_11 = arith.constant dense<0.000000e+00> : vector<8x64xf32>
    %17 = tpu.matmul %15, %6, %cst_11 {dimension_numbers = #tpu.dot_dimension_numbers<[1], [0], [0], [1], [0, 0, 1, 1], [], []>} : vector<8x64xf32>, vector<64x64xf32>, vector<8x64xf32> -> vector<8x64xf32>
    %18 = arith.addf %16, %17 : vector<8x64xf32>
    %19 = math.tanh %18 : vector<8x64xf32>
    %20 = vector.extract_strided_slice %5 {offsets = [24, 0], sizes = [8, 64], strides = [1, 1]} : vector<64x64xf32> to vector<8x64xf32>
    %cst_12 = arith.constant dense<0.000000e+00> : vector<8x64xf32>
    %21 = tpu.matmul %19, %6, %cst_12 {dimension_numbers = #tpu.dot_dimension_numbers<[1], [0], [0], [1], [0, 0, 1, 1], [], []>} : vector<8x64xf32>, vector<64x64xf32>, vector<8x64xf32> -> vector<8x64xf32>
    %22 = arith.addf %20, %21 : vector<8x64xf32>
    %23 = math.tanh %22 : vector<8x64xf32>
    %24 = vector.extract_strided_slice %5 {offsets = [32, 0], sizes = [8, 64], strides = [1, 1]} : vector<64x64xf32> to vector<8x64xf32>
    %cst_13 = arith.constant dense<0.000000e+00> : vector<8x64xf32>
    %25 = tpu.matmul %23, %6, %cst_13 {dimension_numbers = #tpu.dot_dimension_numbers<[1], [0], [0], [1], [0, 0, 1, 1], [], []>} : vector<8x64xf32>, vector<64x64xf32>, vector<8x64xf32> -> vector<8x64xf32>
    %26 = arith.addf %24, %25 : vector<8x64xf32>
    %27 = math.tanh %26 : vector<8x64xf32>
    %28 = vector.extract_strided_slice %5 {offsets = [40, 0], sizes = [8, 64], strides = [1, 1]} : vector<64x64xf32> to vector<8x64xf32>
    %cst_14 = arith.constant dense<0.000000e+00> : vector<8x64xf32>
    %29 = tpu.matmul %27, %6, %cst_14 {dimension_numbers = #tpu.dot_dimension_numbers<[1], [0], [0], [1], [0, 0, 1, 1], [], []>} : vector<8x64xf32>, vector<64x64xf32>, vector<8x64xf32> -> vector<8x64xf32>
    %30 = arith.addf %28, %29 : vector<8x64xf32>
    %31 = math.tanh %30 : vector<8x64xf32>
    %32 = vector.extract_strided_slice %5 {offsets = [48, 0], sizes = [8, 64], strides = [1, 1]} : vector<64x64xf32> to vector<8x64xf32>
    %cst_15 = arith.constant dense<0.000000e+00> : vector<8x64xf32>
    %33 = tpu.matmul %31, %6, %cst_15 {dimension_numbers = #tpu.dot_dimension_numbers<[1], [0], [0], [1], [0, 0, 1, 1], [], []>} : vector<8x64xf32>, vector<64x64xf32>, vector<8x64xf32> -> vector<8x64xf32>
    %34 = arith.addf %32, %33 : vector<8x64xf32>
    %35 = math.tanh %34 : vector<8x64xf32>
    %36 = vector.extract_strided_slice %5 {offsets = [56, 0], sizes = [8, 64], strides = [1, 1]} : vector<64x64xf32> to vector<8x64xf32>
    %cst_16 = arith.constant dense<0.000000e+00> : vector<8x64xf32>
    %37 = tpu.matmul %35, %6, %cst_16 {dimension_numbers = #tpu.dot_dimension_numbers<[1], [0], [0], [1], [0, 0, 1, 1], [], []>} : vector<8x64xf32>, vector<64x64xf32>, vector<8x64xf32> -> vector<8x64xf32>
    %38 = arith.addf %36, %37 : vector<8x64xf32>
    %39 = math.tanh %38 : vector<8x64xf32>
    %c0_17 = arith.constant 0 : index
    %c0_18 = arith.constant 0 : index
    %40 = vector.load %arg8[%c0_17, %c0_18] : memref<8x64xf32, #tpu.memory_space<vmem>>, vector<8x64xf32>
    tpu.vector_store %arg8[%c0_17, %c0_18], %39 {strides = array<i32>} : memref<8x64xf32, #tpu.memory_space<vmem>>, vector<8x64xf32>,
    %c0_19 = arith.constant 0 : index
    %c0_20 = arith.constant 0 : index
    %41 = vector.load %arg4[%c0_19, %c0_20] : memref<1x64xf32, #tpu.memory_space<vmem>>, vector<1x64xf32>
    %42 = vector.broadcast %41 : vector<1x64xf32> to vector<8x64xf32>
    %43 = arith.mulf %39, %42 : vector<8x64xf32>
    %cst_21 = arith.constant dense<0.000000e+00> : vector<8xf32>
    %44 = vector.multi_reduction <add>, %43, %cst_21 [1] : vector<8x64xf32> to vector<8xf32>
    %45 = vector.shape_cast %44 : vector<8xf32> to vector<8x1xf32>
    %c0_22 = arith.constant 0 : index
    %c0_23 = arith.constant 0 : index
    %46 = vector.load %arg5[%c0_22, %c0_23] : memref<1x1xf32, #tpu.memory_space<vmem>>, vector<1x1xf32>
    %47 = vector.broadcast %46 : vector<1x1xf32> to vector<8x1xf32>
    %48 = arith.addf %45, %47 : vector<8x1xf32>
    %c0_24 = arith.constant 0 : index
    %c0_25 = arith.constant 0 : index
    %49 = vector.load %arg7[%c0_24, %c0_25] : memref<8x1xf32, #tpu.memory_space<vmem>>, vector<8x1xf32>
    tpu.vector_store %arg7[%c0_24, %c0_25], %48 {strides = array<i32>} : memref<8x1xf32, #tpu.memory_space<vmem>>, vector<8x1xf32>,
    return
  }
}

</mosaic_0001>

<bundles_post_ra>
// kernel: rnn_critic_forward.1
= control target key start
LH: loop header
LB: loop body
LE: loop exit
PB: predicated region body
PF: predicated region fallthrough
CT: control target
= control target key end

     0   :  { %vm74_vm0 = vcmask 1040384   ;;  %v1225_v0 = vmov 0.0|0.0   ;;  %vm1226_vm1 = vmmov 0   ;;  %v1227_v8 = vmov 0.0   ;;  %s1478_s2 = inlined_call_operand.vmem [shape: f32[64,64], index: 2, kind: input, shape index: {}]   ;;  %s1479_s1 = inlined_call_operand.vmem [shape: f32[25,64], index: 1, kind: input, shape index: {}]   ;;  %s1480_s0 = inlined_call_operand.vmem [shape: f32[64,25], index: 0, kind: input, shape index: {}]   ;;  %s1481_s6 = inlined_call_operand.vmem [shape: f32[8,64], index: 6, kind: input, shape index: {}]   ;;  %s1482_s3 = inlined_call_operand.vmem [shape: f32[1,64], index: 3, kind: input, shape index: {}]   ;;  %s1483_s5 = inlined_call_operand.<no memory space> [shape: f32[1,1], index: 5, kind: input, shape index: {}]   ;;  %s1484_s4 = inlined_call_operand.vmem [shape: f32[1,64], index: 4, kind: input, shape index: {}]   ;;  %s1485_s8 = inlined_call_operand.vmem [shape: f32[8,64], index: 8, kind: output, shape index: {1}]   ;;  %s1486_s7 = inlined_call_operand.vmem [shape: f32[8,1], index: 7, kind: output, shape index: {0}]  }
   0x1   :  { %1109 = vmatprep.subr.bf16.mxu1 %v1225_v0  ;;  %v183_v1 = vld [vmem:[%s1478_s2] sm:$0xff]  ;;  %v184_v2 = vld [vmem:[%s1478_s2 + $0x8] sm:$0xff]  ;;  %v185_v6 = vld [vmem:[%s1478_s2 + $0x10] sm:$0xff]  ;;  %963 = vmatprep.mubr.msk.f32.mxu1 %vm1226_vm1, %v1227_v8  ;;  %vm49_vm2 = vcmask 203776   ;;  %vm1228_vm3 = vmmov 1   ;;  %vm192_vm5 = vcmask 523264  }
   0x2   :  { %v38_v3 = vld [vmem:[%s1479_s1] sm:$0xff]  ;;  %v1284_v4 = vpack.c.bf16 %v184_v2, %v183_v1  ;;  %v39_v5 = vld [vmem:[%s1479_s1 + $0x8] sm:$0xff]  ;;  %v186_v7 = vld [vmem:[%s1478_s2 + $0x18] sm:$0xff]  ;;  %vm813_vm6 = vcmask 7168  }
   0x3   :  { %v1099_v9 = vpack.c.bf16 %v39_v5, %v38_v3  ;;  %v40_v10 = vld [vmem:[%s1479_s1 + $0x10] sm:$0xff]  ;;  %v41_v11 = vld [vmem:[%s1479_s1 + $0x18] sm:$0x1]  ;;  %v1304_v12 = vpack.c.bf16 %v186_v7, %v185_v6  ;;  %vm1104_vm4 = vmpackc.low %vm74_vm0, %vm1228_vm3 }
   0x4   :  { %1111 = vmatpush3.bf16.msra.mxu1 %v1284_v4  ;;  %v1103_v13 = vpack.c.bf16 %v41_v11, %v40_v10  ;;  %v30_v14 = vld [vmem:[%s1480_s0] sm:$0xff]  ;;  %v188_v16 = vld [vmem:[%s1478_s2 + $0x28] sm:$0xff]  ;;  %v189_v18 = vld [vmem:[%s1478_s2 + $0x30] sm:$0xff] }
   0x5   :  { %1100 = vmatprep.subr.bf16.mxu0 %v1099_v9  ;;  %1112 = vmatprep.subr.bf16.mxu1 %v1225_v0  ;;  %v187_v15 = vld [vmem:[%s1478_s2 + $0x20] sm:$0xff]  ;;  %v190_v19 = vld [vmem:[%s1478_s2 + $0x38] sm:$0xff]  ;;  %v31_v20 = vld [vmem:[%s1480_s0 + $0x8] sm:$0xff] }
   0x6   :  { %1102 = vmatpush3.bf16.msra.mxu0 %v1099_v9  ;;  %935 = vmatprep.mubr.msk.f32.mxu0 %vm49_vm2, %v30_v14  ;;  %v1319_v17 = vpack.c.bf16 %v188_v16, %v187_v15  ;;  %v1333_v21 = vpack.c.bf16 %v190_v19, %v189_v18  ;;  %v191_v22 = vld [vmem:[%s1481_s6] sm:$0xff]  ;;  %v32_v23 = vld [vmem:[%s1480_s0 + $0x10] sm:$0xff]  ;;  %v33_v24 = vld [vmem:[%s1480_s0 + $0x18] sm:$0xff]  ;;  %v14_v9 = vstv %s1483_s5 }
   0x7   :  { %1105 = vmatprep.subr.msk.bf16.mxu0 %vm1104_vm4, %v1103_v13  ;;  %v34_v25 = vld [vmem:[%s1480_s0 + $0x20] sm:$0xff]  ;;  %v35_v26 = vld [vmem:[%s1480_s0 + $0x28] sm:$0xff]  ;;  %v36_v27 = vld [vmem:[%s1480_s0 + $0x30] sm:$0xff]  ;;  %15 = vst [vmem:[#allocation2] sm:$0x1] %v14_v9 }
   0x8   :  { %1114 = vmatpush3.bf16.msra.mxu1 %v1304_v12  ;;  %v37_v28 = vld [vmem:[%s1480_s0 + $0x38] sm:$0xff]  ;;  %v1390_v30 = vld [vmem:[%s1482_s3] ss:$0 sm:$0xff] }
   0x9   :  { %1115 = vmatprep.subr.bf16.mxu1 %v1225_v0  ;;  %v841_v14 = vld [vmem:[%s1484_s4] ss:$0 sm:$0xff] }
   0xa   :  { %1108 = vmatpush3.bf16.msk.msra.mxu0 %vm1104_vm4, %v1103_v13 }
   0xb   :  { %1121 = vmatprep.subr.bf16.mxu0 %v1225_v0 }
   0xc   :  { %1117 = vmatpush3.bf16.msra.mxu1 %v1319_v17 }
   0xd   :  { %936 = vmatmul.mubr.msk.f32.vlgmr.msra.gmra.mrb[0].mxu0 %vm49_vm2, %v31_v20  ;;  %1118 = vmatprep.subr.bf16.mxu1 %v1225_v0 }
   0xe   :  { %1123 = vmatpush3.bf16.msra.mxu0 %v1284_v4  ;;  %938 = vmatprep.mubr.msk.f32.mxu0 %vm49_vm2, %v32_v23  ;;  %v842_v18 = vld [vmem:[#allocation2] ss:$0 sm:$0xff] }
   0xf   :  { %1124 = vmatprep.subr.bf16.mxu0 %v1225_v0 }
  0x10   :  { %1120 = vmatpush3.bf16.msra.mxu1 %v1333_v21 }
  0x11   :  { %1133 = vmatprep.subr.bf16.mxu1 %v1225_v0  ;;  %939 = vmatmul.mubr.msk.f32.gmra.mrb[2].mxu0 %vm49_vm2, %v33_v24 }
  0x12   :  { %1126 = vmatpush3.bf16.msra.mxu0 %v1304_v12  ;;  %941 = vmatprep.mubr.msk.f32.mxu0 %vm49_vm2, %v34_v25 }
  0x13   :  { %964 = vmatmul.mubr.msk.f32.vlgmr.msra.gmra.mrb[0].mxu1 %vm192_vm5, %v191_v22  ;;  %1127 = vmatprep.subr.bf16.mxu0 %v1225_v0 }
  0x14   :  { %1135 = vmatpush3.bf16.msra.mxu1 %v1284_v4  ;;  %1001 = vmatprep.mubr.msk.f32.mxu1 %vm1226_vm1, %v1227_v8 }
  0x15   :  { %1136 = vmatprep.subr.bf16.mxu1 %v1225_v0  ;;  %942 = vmatmul.mubr.msk.f32.gmra.mrb[4].mxu0 %vm49_vm2, %v35_v26 }
  0x16   :  { %1129 = vmatpush3.bf16.msra.mxu0 %v1319_v17  ;;  %944 = vmatprep.mubr.msk.f32.mxu0 %vm49_vm2, %v36_v27 }
  0x17   :  { %1130 = vmatprep.subr.bf16.mxu0 %v1225_v0 }
  0x18   :  { %1138 = vmatpush3.bf16.msra.mxu1 %v1304_v12 }
  0x19   :  { %1139 = vmatprep.subr.bf16.mxu1 %v1225_v0  ;;  %945 = vmatmul.mubr.msk.f32.gmra.mrb[6].mxu0 %vm49_vm2, %v37_v28 }
  0x1a   :  { %1132 = vmatpush3.bf16.msra.mxu0 %v1333_v21  ;;  %982 = vmatprep.mubr.msk.f32.mxu0 %vm1226_vm1, %v1227_v8 }
  0x1b   :  { %1145 = vmatprep.subr.bf16.mxu0 %v1225_v0 }
  0x1c   :  { %1141 = vmatpush3.bf16.msra.mxu1 %v1319_v17 }
  0x1d   :  { %1142 = vmatprep.subr.bf16.mxu1 %v1225_v0 }
  0x20   :  { %1144 = vmatpush3.bf16.msra.mxu1 %v1333_v21 }
  0x21   :  { %1157 = vmatprep.subr.bf16.mxu1 %v1225_v0 }
  0xe0   :  { %v937_v29 = vpop.f32.mrb[0].mxu0 }
  0xe1   :  { %v144_v31 = vpop.f32.mrb[1].mxu0  ;;  %v150_v43 = vadd.f32 %v937_v29, %v1390_v30 }
  0xe2   :  { %v145_v32 = vadd.f32 %v1390_v30, %v144_v31 }
  0xe4   :  { %v940_v37 = vpop.f32.mrb[2].mxu0 }
  0xe5   :  { %v154_v38 = vpop.f32.mrb[3].mxu0  ;;  %v160_v53 = vadd.f32 %v940_v37, %v1390_v30 }
  0xe6   :  { %v262_v33 = vpop.f32.mrb[0].mxu1  ;;  %v155_v48 = vadd.f32 %v1390_v30, %v154_v38 }
  0xe7   :  { %v266_v34 = vadd.f32 %v262_v33, %v145_v32  ;;  %v965_v35 = vpop.f32.mrb[1].mxu1 }
  0xe8   :  { %v1404_v39 = vpop.f32.mrb[4].mxu0 }
  0xe9   :  { %1209 = vtanh.f32 %v266_v34  ;;  %v164_v40 = vpop.f32.mrb[5].mxu0  ;;  %v170_v63 = vadd.f32 %v1404_v39, %v1390_v30 }
  0xea   :  { %v165_v58 = vadd.f32 %v1390_v30, %v164_v40 }
  0xec   :  { %v1406_v41 = vpop.f32.mrb[6].mxu0 }
  0xed   :  { %v1408_v42 = vpop.f32.mrb[7].mxu0  ;;  %v180_v10 = vadd.f32 %v1406_v41, %v1390_v30 }
  0xee   :  { %v175_v5 = vadd.f32 %v1390_v30, %v1408_v42 }
  0xf3   :  { %v1210_v36 = vpop.eup %1209 }
  0xf4   :  { %983 = vmatmul.mubr.msk.f32.vlgmr.msra.gmra.mrb[8].mxu0 %vm192_vm5, %v1210_v36 }
  0xf5   :  { %1147 = vmatpush3.bf16.msra.mxu0 %v1284_v4  ;;  %1020 = vmatprep.mubr.msk.f32.mxu0 %vm1226_vm1, %v1227_v8 }
  0xf6   :  { %1148 = vmatprep.subr.bf16.mxu0 %v1225_v0 }
  0xf9   :  { %1150 = vmatpush3.bf16.msra.mxu0 %v1304_v12 }
  0xfa   :  { %1151 = vmatprep.subr.bf16.mxu0 %v1225_v0 }
  0xfd   :  { %1153 = vmatpush3.bf16.msra.mxu0 %v1319_v17 }
  0xfe   :  { %1154 = vmatprep.subr.bf16.mxu0 %v1225_v0 }
 0x101   :  { %1156 = vmatpush3.bf16.msra.mxu0 %v1333_v21 }
 0x102   :  { %1169 = vmatprep.subr.bf16.mxu0 %v1225_v0 }
 0x1c7   :  { %v337_v44 = vpop.f32.mrb[8].mxu0 }
 0x1c8   :  { %v341_v45 = vadd.f32 %v337_v44, %v150_v43  ;;  %v984_v46 = vpop.f32.mrb[9].mxu0 }
 0x1ca   :  { %1211 = vtanh.f32 %v341_v45 }
 0x1d4   :  { %v1212_v47 = vpop.eup %1211 }
 0x1d5   :  { %1002 = vmatmul.mubr.msk.f32.vlgmr.msra.gmra.mrb[2].mxu1 %vm192_vm5, %v1212_v47 }
 0x1d6   :  { %1159 = vmatpush3.bf16.msra.mxu1 %v1284_v4  ;;  %1039 = vmatprep.mubr.msk.f32.mxu1 %vm1226_vm1, %v1227_v8 }
 0x1d7   :  { %1160 = vmatprep.subr.bf16.mxu1 %v1225_v0 }
 0x1da   :  { %1162 = vmatpush3.bf16.msra.mxu1 %v1304_v12 }
 0x1db   :  { %1163 = vmatprep.subr.bf16.mxu1 %v1225_v0 }
 0x1de   :  { %1165 = vmatpush3.bf16.msra.mxu1 %v1319_v17 }
 0x1df   :  { %1166 = vmatprep.subr.bf16.mxu1 %v1225_v0 }
 0x1e2   :  { %1168 = vmatpush3.bf16.msra.mxu1 %v1333_v21 }
 0x1e3   :  { %1181 = vmatprep.subr.bf16.mxu1 %v1225_v0 }
 0x2a8   :  { %v412_v49 = vpop.f32.mrb[2].mxu1 }
 0x2a9   :  { %v416_v50 = vadd.f32 %v412_v49, %v155_v48  ;;  %v1003_v51 = vpop.f32.mrb[3].mxu1 }
 0x2ab   :  { %1213 = vtanh.f32 %v416_v50 }
 0x2b5   :  { %v1214_v52 = vpop.eup %1213 }
 0x2b6   :  { %1021 = vmatmul.mubr.msk.f32.vlgmr.msra.gmra.mrb[10].mxu0 %vm192_vm5, %v1214_v52 }
 0x2b7   :  { %1171 = vmatpush3.bf16.msra.mxu0 %v1284_v4  ;;  %1058 = vmatprep.mubr.msk.f32.mxu0 %vm1226_vm1, %v1227_v8 }
 0x2b8   :  { %1172 = vmatprep.subr.bf16.mxu0 %v1225_v0 }
 0x2bb   :  { %1174 = vmatpush3.bf16.msra.mxu0 %v1304_v12 }
 0x2bc   :  { %1175 = vmatprep.subr.bf16.mxu0 %v1225_v0 }
 0x2bf   :  { %1177 = vmatpush3.bf16.msra.mxu0 %v1319_v17 }
 0x2c0   :  { %1178 = vmatprep.subr.bf16.mxu0 %v1225_v0 }
 0x2c3   :  { %1180 = vmatpush3.bf16.msra.mxu0 %v1333_v21 }
 0x2c4   :  { %1193 = vmatprep.subr.bf16.mxu0 %v1225_v0 }
 0x389   :  { %v487_v54 = vpop.f32.mrb[10].mxu0 }
 0x38a   :  { %v491_v55 = vadd.f32 %v487_v54, %v160_v53  ;;  %v1022_v56 = vpop.f32.mrb[11].mxu0 }
 0x38c   :  { %1215 = vtanh.f32 %v491_v55 }
 0x396   :  { %v1216_v57 = vpop.eup %1215 }
 0x397   :  { %1040 = vmatmul.mubr.msk.f32.vlgmr.msra.gmra.mrb[4].mxu1 %vm192_vm5, %v1216_v57 }
 0x398   :  { %1183 = vmatpush3.bf16.msra.mxu1 %v1284_v4  ;;  %1077 = vmatprep.mubr.msk.f32.mxu1 %vm1226_vm1, %v1227_v8 }
 0x399   :  { %1184 = vmatprep.subr.bf16.mxu1 %v1225_v0 }
 0x39c   :  { %1186 = vmatpush3.bf16.msra.mxu1 %v1304_v12 }
 0x39d   :  { %1187 = vmatprep.subr.bf16.mxu1 %v1225_v0 }
 0x3a0   :  { %1189 = vmatpush3.bf16.msra.mxu1 %v1319_v17 }
 0x3a1   :  { %1190 = vmatprep.subr.bf16.mxu1 %v1225_v0 }
 0x3a4   :  { %1192 = vmatpush3.bf16.msra.mxu1 %v1333_v21 }
 0x46a   :  { %v562_v59 = vpop.f32.mrb[4].mxu1 }
 0x46b   :  { %v566_v60 = vadd.f32 %v562_v59, %v165_v58  ;;  %v1041_v61 = vpop.f32.mrb[5].mxu1 }
 0x46d   :  { %1217 = vtanh.f32 %v566_v60 }
 0x477   :  { %v1218_v62 = vpop.eup %1217 }
 0x478   :  { %1059 = vmatmul.mubr.msk.f32.vlgmr.msra.gmra.mrb[12].mxu0 %vm192_vm5, %v1218_v62 }
 0x479   :  { %1195 = vmatpush3.bf16.msra.mxu0 %v1284_v4  ;;  %1096 = vmatprep.mubr.msk.f32.mxu0 %vm1226_vm1, %v1227_v8 }
 0x47a   :  { %1196 = vmatprep.subr.bf16.mxu0 %v1225_v0 }
 0x47d   :  { %1198 = vmatpush3.bf16.msra.mxu0 %v1304_v12 }
 0x47e   :  { %1199 = vmatprep.subr.bf16.mxu0 %v1225_v0 }
 0x481   :  { %1201 = vmatpush3.bf16.msra.mxu0 %v1319_v17 }
 0x482   :  { %1202 = vmatprep.subr.bf16.mxu0 %v1225_v0 }
 0x485   :  { %1204 = vmatpush3.bf16.msra.mxu0 %v1333_v21 }
 0x54b   :  { %v637_v1 = vpop.f32.mrb[12].mxu0 }
 0x54c   :  { %v641_v2 = vadd.f32 %v637_v1, %v170_v63  ;;  %v1060_v3 = vpop.f32.mrb[13].mxu0 }
 0x54e   :  { %1219 = vtanh.f32 %v641_v2 }
 0x558   :  { %v1220_v4 = vpop.eup %1219 }
 0x559   :  { %1078 = vmatmul.mubr.msk.f32.vlgmr.msra.gmra.mrb[6].mxu1 %vm192_vm5, %v1220_v4 }
 0x62c   :  { %v712_v6 = vpop.f32.mrb[6].mxu1 }
 0x62d   :  { %v716_v7 = vadd.f32 %v712_v6, %v175_v5  ;;  %v1079_v8 = vpop.f32.mrb[7].mxu1 }
 0x62f   :  { %1221 = vtanh.f32 %v716_v7 }
 0x639   :  { %v1222_v0 = vpop.eup %1221 }
 0x63a   :  { %1097 = vmatmul.mubr.msk.f32.vlgmr.msra.gmra.mrb[14].mxu0 %vm192_vm5, %v1222_v0 }
 0x70d   :  { %v787_v11 = vpop.f32.mrb[14].mxu0 }
 0x70e   :  { %v791_v12 = vadd.f32 %v787_v11, %v180_v10  ;;  %v1098_v13 = vpop.f32.mrb[15].mxu0 }
 0x710   :  { %1223 = vtanh.f32 %v791_v12 }
 0x71a   :  { %v1224_v15 = vpop.eup %1223 }
 0x71b   :  { %793 = vst.msk [vmem:[%s1485_s8] sm:$0xff] %vm192_vm5, %v1224_v15  ;;  %v801_v16 = vmul.f32 %v1224_v15, %v841_v14 }
 0x71d   :  { %v802_v17 = vsel %vm192_vm5, %v801_v16, 0.0 }
 0x71e   :  { %803 = vadd.xlane.f32.xlu0 %v802_v17 }
 0x7ab   :  { %v804_v19 = vpop.xlane.xlu0 %803 }
 0x7ac   :  { %v812_v20 = vadd.f32 %v842_v18, %v804_v19 }
 0x7ae   :  { %814 = vst.msk [vmem:[%s1486_s7] sm:$0xff] %vm813_vm6, %v812_v20 }

</bundles_post_ra>
